<compile_context>
chip_gen: v6e
topology: v6e:2x2x1
jax: 0.10.0
libtpu: 0.0.40
codegen_flags: <defaults>
</compile_context>

<pallas_src>
import jax
import jax.numpy as jnp
from jax import lax
from jax.experimental import pallas as pl
from jax.experimental.pallas import tpu as pltpu

_LN_EPS = 1e-5


def _vmem_limit_bytes():
    """3/4 of physical VMEM per TensorCore, capped; safe fallback off-TPU."""
    try:
        cap = getattr(pltpu.get_tpu_info(), "vmem_capacity_bytes", None)
        if cap:
            return int(min(cap * 3 // 4, 112 * 1024 * 1024))
    except Exception:
        pass
    return 48 * 1024 * 1024


def _layer_norm_f32(z, gamma, beta):
    mean = jnp.mean(z, axis=-1, keepdims=True)
    var = jnp.mean((z - mean) ** 2, axis=-1, keepdims=True)
    return (z - mean) * lax.rsqrt(var + _LN_EPS) * gamma + beta


# ------------------- fused encoder block (one pallas_call) ------------------ #

def _encoder_block_kernel(vl_ref,                                   # SMEM (B,)
                          x_ref, wq_ref, wk_ref, wv_ref,
                          bq_ref, bk_ref, bv_ref, wo_ref, bo_ref,
                          g1_ref, be1_ref, w1_ref, bf1_ref,
                          w2_ref, bf2_ref, g2_ref, be2_ref,
                          o_ref, acc_ref):
    b = pl.program_id(0)
    h = pl.program_id(1)
    num_heads = pl.num_programs(1)

    x = x_ref[0]                                            # (S, H) bf16

    @pl.when(h == 0)
    def _():
        acc_ref[...] = jnp.zeros_like(acc_ref)

    # Per-head projections: bf16 x bf16 MXU matmuls, f32 accumulation.
    # 1/sqrt(hd) is already folded into wq/bq offline.
    qh = (jnp.dot(x, wq_ref[0], preferred_element_type=jnp.float32)
          + bq_ref[0]).astype(jnp.bfloat16)                 # (S, hd)
    kh = (jnp.dot(x, wk_ref[0], preferred_element_type=jnp.float32)
          + bk_ref[0]).astype(jnp.bfloat16)                 # (S, hd)
    vh = (jnp.dot(x, wv_ref[0], preferred_element_type=jnp.float32)
          + bv_ref[0]).astype(jnp.bfloat16)                 # (S, hd)

    # scores = qh @ kh^T without materializing the transpose.
    scores = lax.dot_general(qh, kh, (((1,), (1,)), ((), ())),
                             preferred_element_type=jnp.float32)   # (S, S) f32

    # d2l masked_softmax: key-only mask from valid_lens, same for all rows.
    vl = vl_ref[b]
    key_ids = lax.broadcasted_iota(jnp.int32, scores.shape, 1)
    scores = jnp.where(key_ids < vl, scores, -1e6)

    # Softmax in f32; divide moved to the EUP via approximate reciprocal.
    m = jnp.max(scores, axis=-1, keepdims=True)
    p = jnp.exp(scores - m)
    denom = jnp.sum(p, axis=-1, keepdims=True)
    probs = (p * pl.reciprocal(denom, approx=True)).astype(jnp.bfloat16)

    ctx = jnp.dot(probs, vh, preferred_element_type=jnp.float32)   # (S, hd)

    # Fold the output projection into the head reduction:
    #   concat_h(ctx_h) @ Wo == sum_h ctx_h @ Wo[h]
    acc_ref[...] += jnp.dot(ctx.astype(jnp.bfloat16), wo_ref[0],
                            preferred_element_type=jnp.float32)    # (S, H)

    @pl.when(h == num_heads - 1)
    def _():
        # AddNorm 1 (f32 statistics).
        z1 = x.astype(jnp.float32) + acc_ref[...] + bo_ref[...]
        y = _layer_norm_f32(z1, g1_ref[...], be1_ref[...])          # (S, H) f32

        # Positionwise FFN (bf16 MXU operands, f32 accumulation, ReLU in f32).
        yb = y.astype(jnp.bfloat16)
        hmid = (jnp.dot(yb, w1_ref[...], preferred_element_type=jnp.float32)
                + bf1_ref[...])
        hmid = jnp.maximum(hmid, 0.0).astype(jnp.bfloat16)
        f = (jnp.dot(hmid, w2_ref[...], preferred_element_type=jnp.float32)
             + bf2_ref[...])

        # AddNorm 2.
        z2 = y + f
        out = _layer_norm_f32(z2, g2_ref[...], be2_ref[...])
        # TODO(synk): for deployed configs with H < 128, pad H to 128 for a
        # lane-dense output store (demo H=32; real BERT H=768 is fine).
        o_ref[0] = out.astype(o_ref.dtype)


def encoder_block(x, valid_lens, layer, num_heads):
    B, S, H = x.shape
    hd = H // num_heads
    F = layer["w1"].shape[1]

    grid_spec = pltpu.PrefetchScalarGridSpec(
        num_scalar_prefetch=1,
        grid=(B, num_heads),
        in_specs=[
            pl.BlockSpec((1, S, H), lambda b, h, vl: (b, 0, 0)),    # X
            pl.BlockSpec((1, H, hd), lambda b, h, vl: (h, 0, 0)),   # Wq (head-major)
            pl.BlockSpec((1, H, hd), lambda b, h, vl: (h, 0, 0)),   # Wk
            pl.BlockSpec((1, H, hd), lambda b, h, vl: (h, 0, 0)),   # Wv
            pl.BlockSpec((1, 1, hd), lambda b, h, vl: (h, 0, 0)),   # bq
            pl.BlockSpec((1, 1, hd), lambda b, h, vl: (h, 0, 0)),   # bk
            pl.BlockSpec((1, 1, hd), lambda b, h, vl: (h, 0, 0)),   # bv
            pl.BlockSpec((1, hd, H), lambda b, h, vl: (h, 0, 0)),   # Wo (head-major)
            pl.BlockSpec((1, H), lambda b, h, vl: (0, 0)),          # bo
            pl.BlockSpec((1, H), lambda b, h, vl: (0, 0)),          # gamma1
            pl.BlockSpec((1, H), lambda b, h, vl: (0, 0)),          # beta1
            pl.BlockSpec((H, F), lambda b, h, vl: (0, 0)),          # W1
            pl.BlockSpec((1, F), lambda b, h, vl: (0, 0)),          # b1
            pl.BlockSpec((F, H), lambda b, h, vl: (0, 0)),          # W2
            pl.BlockSpec((1, H), lambda b, h, vl: (0, 0)),          # b2
            pl.BlockSpec((1, H), lambda b, h, vl: (0, 0)),          # gamma2
            pl.BlockSpec((1, H), lambda b, h, vl: (0, 0)),          # beta2
        ],
        out_specs=pl.BlockSpec((1, S, H), lambda b, h, vl: (b, 0, 0)),
        scratch_shapes=[pltpu.VMEM((S, H), jnp.float32)],           # head accum
    )
    return pl.pallas_call(
        _encoder_block_kernel,
        out_shape=jax.ShapeDtypeStruct((B, S, H), jnp.bfloat16),
        grid_spec=grid_spec,
        compiler_params=pltpu.CompilerParams(
            dimension_semantics=("parallel", "arbitrary"),
            vmem_limit_bytes=_vmem_limit_bytes(),
        ),
    )(valid_lens, x, layer["wq"], layer["wk"], layer["wv"],
      layer["bq"], layer["bk"], layer["bv"], layer["wo"], layer["bo"],
      layer["g1"], layer["be1"], layer["w1"], layer["b1"],
      layer["w2"], layer["b2"], layer["g2"], layer["be2"])


# ------------------------- parameters / forward pass ------------------------ #

def init_params(key, vocab_size, num_hiddens, ffn_hiddens, num_layers,
                num_heads, max_len):
    H = num_hiddens
    nh = num_heads
    hd = H // nh
    scale = 1.0 / float(hd) ** 0.5
    keys = jax.random.split(key, 3 + num_layers)

    def dense(k, din, dout):
        return jax.random.normal(k, (din, dout), jnp.float32) * 0.02

    def head_major(w, fold_scale=False):
        # (H, H) -> (nh, H, hd); optionally fold 1/sqrt(hd) into the Q weight.
        if fold_scale:
            w = w * scale
        return jnp.transpose(w.reshape(H, nh, hd), (1, 0, 2)).astype(jnp.bfloat16)

    params = {
        "token_emb": jax.random.normal(keys[0], (vocab_size, H),
                                       jnp.float32) * 0.02,
        "seg_emb": jax.random.normal(keys[1], (2, H), jnp.float32) * 0.02,
        # nn.Parameter(torch.rand(1, max_len, num_hiddens)) -> uniform [0, 1)
        "pos_emb": jax.random.uniform(keys[2], (1, max_len, H), jnp.float32),
        "layers": [],
    }

    for i in range(num_layers):
        lk = jax.random.split(keys[3 + i], 6)
        wq = dense(lk[0], H, H)
        wk = dense(lk[1], H, H)
        wv = dense(lk[2], H, H)
        wo = dense(lk[3], H, H)
        params["layers"].append(dict(
            wq=head_major(wq, fold_scale=True),
            wk=head_major(wk),
            wv=head_major(wv),
            # biases (zero init); scale would also be folded into bq (0*s = 0).
            bq=jnp.zeros((nh, 1, hd), jnp.float32),
            bk=jnp.zeros((nh, 1, hd), jnp.float32),
            bv=jnp.zeros((nh, 1, hd), jnp.float32),
            # Wo rows grouped by head -> (nh, hd, H)
            wo=wo.reshape(nh, hd, H).astype(jnp.bfloat16),
            bo=jnp.zeros((1, H), jnp.float32),
            g1=jnp.ones((1, H), jnp.float32),
            be1=jnp.zeros((1, H), jnp.float32),
            w1=dense(lk[4], H, ffn_hiddens).astype(jnp.bfloat16),
            b1=jnp.zeros((1, ffn_hiddens), jnp.float32),
            w2=dense(lk[5], ffn_hiddens, H).astype(jnp.bfloat16),
            b2=jnp.zeros((1, H), jnp.float32),
            g2=jnp.ones((1, H), jnp.float32),
            be2=jnp.zeros((1, H), jnp.float32),
        ))
    return params


def bert_encoder_forward(params, tokens, segments, valid_lens, num_heads):
    B, S = tokens.shape

    # Embedding lookups are gather glue (plain JAX); hot paths are Pallas.
    X = params["token_emb"][tokens] + params["seg_emb"][segments]
    X = X + params["pos_emb"][:, :S, :]
    X = X.astype(jnp.bfloat16)

    for layer in params["layers"]:
        X = encoder_block(X, valid_lens, layer, num_heads)
    return X.astype(jnp.float32)


# ----------------------------------- main ----------------------------------- #

if __name__ == "__main__":
    vocab_size = 100
    num_hiddens = 32       # norm_shape = [32], ffn_input = 32
    ffn_hiddens = 64
    num_heads = 2
    num_layers = 2
    max_len = 1000
    B, S = 2, 8

    root = jax.random.PRNGKey(0)
    kp, kt, ks = jax.random.split(root, 3)

    params = init_params(kp, vocab_size, num_hiddens, ffn_hiddens,
                         num_layers, num_heads, max_len)

    tokens = jax.random.randint(kt, (B, S), 0, vocab_size, dtype=jnp.int32)
    segments = jax.random.randint(ks, (B, S), 0, 2, dtype=jnp.int32)
    valid_lens = jnp.array([8, 5], dtype=jnp.int32)

    out = bert_encoder_forward(params, tokens, segments, valid_lens, num_heads)
    out = jax.block_until_ready(out)
    assert out.shape == (B, S, num_hiddens)
    assert bool(jnp.all(jnp.isfinite(out)))
    print("KERNEL_OK")
</pallas_src>

<mosaic_0001>
module attributes {stable_mosaic.version = 11 : i64} {
  func.func @_encoder_block_kernel(%arg0: i32, %arg1: i32, %arg2: memref<2xi32, #tpu.memory_space<smem>>, %arg3: memref<1x8x32xbf16, #tpu.memory_space<vmem>>, %arg4: memref<1x32x16xbf16, #tpu.memory_space<vmem>>, %arg5: memref<1x32x16xbf16, #tpu.memory_space<vmem>>, %arg6: memref<1x32x16xbf16, #tpu.memory_space<vmem>>, %arg7: memref<1x1x16xf32, #tpu.memory_space<vmem>>, %arg8: memref<1x1x16xf32, #tpu.memory_space<vmem>>, %arg9: memref<1x1x16xf32, #tpu.memory_space<vmem>>, %arg10: memref<1x16x32xbf16, #tpu.memory_space<vmem>>, %arg11: memref<1x32xf32, #tpu.memory_space<vmem>>, %arg12: memref<1x32xf32, #tpu.memory_space<vmem>>, %arg13: memref<1x32xf32, #tpu.memory_space<vmem>>, %arg14: memref<32x64xbf16, #tpu.memory_space<vmem>>, %arg15: memref<1x64xf32, #tpu.memory_space<vmem>>, %arg16: memref<64x32xbf16, #tpu.memory_space<vmem>>, %arg17: memref<1x32xf32, #tpu.memory_space<vmem>>, %arg18: memref<1x32xf32, #tpu.memory_space<vmem>>, %arg19: memref<1x32xf32, #tpu.memory_space<vmem>>, %arg20: memref<1x8x32xbf16, #tpu.memory_space<vmem>>, %arg21: memref<8x32xf32, #tpu.memory_space<vmem>>) attributes {dimension_semantics = [#tpu.dimension_semantics<parallel>, #tpu.dimension_semantics<arbitrary>], iteration_bounds = array<i64: 2, 2>, scalar_prefetch = 1 : i64, scratch_operands = 1 : i64, tpu.core_type = #tpu.core_type<tc>, window_params = [{transform_indices = @transform_0, window_bounds = array<i64: 1, 8, 32>}, {transform_indices = @transform_1, window_bounds = array<i64: 1, 32, 16>}, {transform_indices = @transform_2, window_bounds = array<i64: 1, 32, 16>}, {transform_indices = @transform_3, window_bounds = array<i64: 1, 32, 16>}, {transform_indices = @transform_4, window_bounds = array<i64: 1, 1, 16>}, {transform_indices = @transform_5, window_bounds = array<i64: 1, 1, 16>}, {transform_indices = @transform_6, window_bounds = array<i64: 1, 1, 16>}, {transform_indices = @transform_7, window_bounds = array<i64: 1, 16, 32>}, {pipeline_mode = #tpu.pipeline_mode<synchronous>, transform_indices = @transform_8, window_bounds = array<i64: 1, 32>}, {pipeline_mode = #tpu.pipeline_mode<synchronous>, transform_indices = @transform_9, window_bounds = array<i64: 1, 32>}, {pipeline_mode = #tpu.pipeline_mode<synchronous>, transform_indices = @transform_10, window_bounds = array<i64: 1, 32>}, {pipeline_mode = #tpu.pipeline_mode<synchronous>, transform_indices = @transform_11, window_bounds = array<i64: 32, 64>}, {pipeline_mode = #tpu.pipeline_mode<synchronous>, transform_indices = @transform_12, window_bounds = array<i64: 1, 64>}, {pipeline_mode = #tpu.pipeline_mode<synchronous>, transform_indices = @transform_13, window_bounds = array<i64: 64, 32>}, {pipeline_mode = #tpu.pipeline_mode<synchronous>, transform_indices = @transform_14, window_bounds = array<i64: 1, 32>}, {pipeline_mode = #tpu.pipeline_mode<synchronous>, transform_indices = @transform_15, window_bounds = array<i64: 1, 32>}, {pipeline_mode = #tpu.pipeline_mode<synchronous>, transform_indices = @transform_16, window_bounds = array<i64: 1, 32>}, {transform_indices = @transform_17, window_bounds = array<i64: 1, 8, 32>}]} {
    %c0 = arith.constant 0 : index
    %c0_0 = arith.constant 0 : index
    %c0_1 = arith.constant 0 : index
    %0 = vector.load %arg3[%c0, %c0_0, %c0_1] : memref<1x8x32xbf16, #tpu.memory_space<vmem>>, vector<1x8x32xbf16>
    %1 = vector.shape_cast %0 : vector<1x8x32xbf16> to vector<8x32xbf16>
    %c0_i32 = arith.constant 0 : i32
    %2 = arith.cmpi eq, %arg1, %c0_i32 : i32
    %3 = arith.extui %2 : i1 to i32
    %c0_i32_2 = arith.constant 0 : i32
    %4 = arith.cmpi ne, %3, %c0_i32_2 : i32
    scf.if %4 {
      %cst_37 = arith.constant 0.000000e+00 : f32
      %59 = vector.broadcast %cst_37 : f32 to vector<8x32xf32>
      %c0_38 = arith.constant 0 : index
      %c0_39 = arith.constant 0 : index
      %60 = vector.load %arg21[%c0_38, %c0_39] : memref<8x32xf32, #tpu.memory_space<vmem>>, vector<8x32xf32>
      tpu.vector_store %arg21[%c0_38, %c0_39], %59 {strides = array<i32>} : memref<8x32xf32, #tpu.memory_space<vmem>>, vector<8x32xf32>,
    } else {
    }
    %c0_3 = arith.constant 0 : index
    %c0_4 = arith.constant 0 : index
    %c0_5 = arith.constant 0 : index
    %5 = vector.load %arg4[%c0_3, %c0_4, %c0_5] : memref<1x32x16xbf16, #tpu.memory_space<vmem>>, vector<1x32x16xbf16>
    %6 = vector.shape_cast %5 : vector<1x32x16xbf16> to vector<32x16xbf16>
    %cst = arith.constant dense<0.000000e+00> : vector<8x16xf32>
    %7 = tpu.matmul %1, %6, %cst {dimension_numbers = #tpu.dot_dimension_numbers<[1], [0], [0], [1], [0, 0, 1, 1], [], []>} : vector<8x32xbf16>, vector<32x16xbf16>, vector<8x16xf32> -> vector<8x16xf32>
    %c0_6 = arith.constant 0 : index
    %c0_7 = arith.constant 0 : index
    %c0_8 = arith.constant 0 : index
    %8 = vector.load %arg7[%c0_6, %c0_7, %c0_8] : memref<1x1x16xf32, #tpu.memory_space<vmem>>, vector<1x1x16xf32>
    %9 = vector.shape_cast %8 : vector<1x1x16xf32> to vector<1x16xf32>
    %10 = vector.broadcast %9 : vector<1x16xf32> to vector<8x16xf32>
    %11 = arith.addf %7, %10 : vector<8x16xf32>
    %12 = arith.truncf %11 : vector<8x16xf32> to vector<8x16xbf16>
    %c0_9 = arith.constant 0 : index
    %c0_10 = arith.constant 0 : index
    %c0_11 = arith.constant 0 : index
    %13 = vector.load %arg5[%c0_9, %c0_10, %c0_11] : memref<1x32x16xbf16, #tpu.memory_space<vmem>>, vector<1x32x16xbf16>
    %14 = vector.shape_cast %13 : vector<1x32x16xbf16> to vector<32x16xbf16>
    %cst_12 = arith.constant dense<0.000000e+00> : vector<8x16xf32>
    %15 = tpu.matmul %1, %14, %cst_12 {dimension_numbers = #tpu.dot_dimension_numbers<[1], [0], [0], [1], [0, 0, 1, 1], [], []>} : vector<8x32xbf16>, vector<32x16xbf16>, vector<8x16xf32> -> vector<8x16xf32>
    %c0_13 = arith.constant 0 : index
    %c0_14 = arith.constant 0 : index
    %c0_15 = arith.constant 0 : index
    %16 = vector.load %arg8[%c0_13, %c0_14, %c0_15] : memref<1x1x16xf32, #tpu.memory_space<vmem>>, vector<1x1x16xf32>
    %17 = vector.shape_cast %16 : vector<1x1x16xf32> to vector<1x16xf32>
    %18 = vector.broadcast %17 : vector<1x16xf32> to vector<8x16xf32>
    %19 = arith.addf %15, %18 : vector<8x16xf32>
    %20 = arith.truncf %19 : vector<8x16xf32> to vector<8x16xbf16>
    %c0_16 = arith.constant 0 : index
    %c0_17 = arith.constant 0 : index
    %c0_18 = arith.constant 0 : index
    %21 = vector.load %arg6[%c0_16, %c0_17, %c0_18] : memref<1x32x16xbf16, #tpu.memory_space<vmem>>, vector<1x32x16xbf16>
    %22 = vector.shape_cast %21 : vector<1x32x16xbf16> to vector<32x16xbf16>
    %cst_19 = arith.constant dense<0.000000e+00> : vector<8x16xf32>
    %23 = tpu.matmul %1, %22, %cst_19 {dimension_numbers = #tpu.dot_dimension_numbers<[1], [0], [0], [1], [0, 0, 1, 1], [], []>} : vector<8x32xbf16>, vector<32x16xbf16>, vector<8x16xf32> -> vector<8x16xf32>
    %c0_20 = arith.constant 0 : index
    %c0_21 = arith.constant 0 : index
    %c0_22 = arith.constant 0 : index
    %24 = vector.load %arg9[%c0_20, %c0_21, %c0_22] : memref<1x1x16xf32, #tpu.memory_space<vmem>>, vector<1x1x16xf32>
    %25 = vector.shape_cast %24 : vector<1x1x16xf32> to vector<1x16xf32>
    %26 = vector.broadcast %25 : vector<1x16xf32> to vector<8x16xf32>
    %27 = arith.addf %23, %26 : vector<8x16xf32>
    %28 = arith.truncf %27 : vector<8x16xf32> to vector<8x16xbf16>
    %cst_23 = arith.constant dense<0.000000e+00> : vector<8x8xf32>
    %29 = tpu.matmul %12, %20, %cst_23 {dimension_numbers = #tpu.dot_dimension_numbers<[1], [1], [0], [0], [0, 0, 1, 0], [], []>} : vector<8x16xbf16>, vector<8x16xbf16>, vector<8x8xf32> -> vector<8x8xf32>
    %30 = arith.index_cast %arg0 : i32 to index
    %31 = memref.load %arg2[%30] : memref<2xi32, #tpu.memory_space<smem>>
    %32 = tpu.iota {dimensions = array<i32: 1>} : vector<8x8xi32>
    %33 = vector.broadcast %31 : i32 to vector<8x8xi32>
    %34 = arith.cmpi slt, %32, %33 : vector<8x8xi32>
    %cst_24 = arith.constant -1.000000e+06 : f32
    %35 = vector.broadcast %cst_24 : f32 to vector<8x8xf32>
    %36 = arith.select %34, %29, %35 : vector<8x8xi1>, vector<8x8xf32>
    %cst_25 = arith.constant dense<0xFF800000> : vector<8xf32>
    %37 = vector.multi_reduction <maximumf>, %36, %cst_25 [1] : vector<8x8xf32> to vector<8xf32>
    %38 = vector.shape_cast %37 : vector<8xf32> to vector<8x1xf32>
    %39 = vector.broadcast %38 : vector<8x1xf32> to vector<8x8xf32>
    %40 = arith.subf %36, %39 : vector<8x8xf32>
    %41 = math.exp %40 : vector<8x8xf32>
    %cst_26 = arith.constant dense<0.000000e+00> : vector<8xf32>
    %42 = vector.multi_reduction <add>, %41, %cst_26 [1] : vector<8x8xf32> to vector<8xf32>
    %43 = vector.shape_cast %42 : vector<8xf32> to vector<8x1xf32>
    %44 = tpu.reciprocal %43 {approx = true} : vector<8x1xf32> -> vector<8x1xf32>
    %45 = vector.broadcast %44 : vector<8x1xf32> to vector<8x8xf32>
    %46 = arith.mulf %41, %45 : vector<8x8xf32>
    %47 = arith.truncf %46 : vector<8x8xf32> to vector<8x8xbf16>
    %cst_27 = arith.constant dense<0.000000e+00> : vector<8x16xf32>
    %48 = tpu.matmul %47, %28, %cst_27 {dimension_numbers = #tpu.dot_dimension_numbers<[1], [0], [0], [1], [0, 0, 1, 1], [], []>} : vector<8x8xbf16>, vector<8x16xbf16>, vector<8x16xf32> -> vector<8x16xf32>
    %c0_28 = arith.constant 0 : index
    %c0_29 = arith.constant 0 : index
    %49 = vector.load %arg21[%c0_28, %c0_29] : memref<8x32xf32, #tpu.memory_space<vmem>>, vector<8x32xf32>
    %50 = arith.truncf %48 : vector<8x16xf32> to vector<8x16xbf16>
    %c0_30 = arith.constant 0 : index
    %c0_31 = arith.constant 0 : index
    %c0_32 = arith.constant 0 : index
    %51 = vector.load %arg10[%c0_30, %c0_31, %c0_32] : memref<1x16x32xbf16, #tpu.memory_space<vmem>>, vector<1x16x32xbf16>
    %52 = vector.shape_cast %51 : vector<1x16x32xbf16> to vector<16x32xbf16>
    %cst_33 = arith.constant dense<0.000000e+00> : vector<8x32xf32>
    %53 = tpu.matmul %50, %52, %cst_33 {dimension_numbers = #tpu.dot_dimension_numbers<[1], [0], [0], [1], [0, 0, 1, 1], [], []>} : vector<8x16xbf16>, vector<16x32xbf16>, vector<8x32xf32> -> vector<8x32xf32>
    %54 = arith.addf %49, %53 : vector<8x32xf32>
    %c0_34 = arith.constant 0 : index
    %c0_35 = arith.constant 0 : index
    %55 = vector.load %arg21[%c0_34, %c0_35] : memref<8x32xf32, #tpu.memory_space<vmem>>, vector<8x32xf32>
    tpu.vector_store %arg21[%c0_34, %c0_35], %54 {strides = array<i32>} : memref<8x32xf32, #tpu.memory_space<vmem>>, vector<8x32xf32>,
    %c1_i32 = arith.constant 1 : i32
    %56 = arith.cmpi eq, %arg1, %c1_i32 : i32
    %57 = arith.extui %56 : i1 to i32
    %c0_i32_36 = arith.constant 0 : i32
    %58 = arith.cmpi ne, %57, %c0_i32_36 : i32
    scf.if %58 {
      %59 = arith.extf %1 : vector<8x32xbf16> to vector<8x32xf32>
      %c0_37 = arith.constant 0 : index
      %c0_38 = arith.constant 0 : index
      %60 = vector.load %arg21[%c0_37, %c0_38] : memref<8x32xf32, #tpu.memory_space<vmem>>, vector<8x32xf32>
      %61 = arith.addf %59, %60 : vector<8x32xf32>
      %c0_39 = arith.constant 0 : index
      %c0_40 = arith.constant 0 : index
      %62 = vector.load %arg11[%c0_39, %c0_40] : memref<1x32xf32, #tpu.memory_space<vmem>>, vector<1x32xf32>
      %63 = vector.broadcast %62 : vector<1x32xf32> to vector<8x32xf32>
      %64 = arith.addf %61, %63 : vector<8x32xf32>
      %c0_41 = arith.constant 0 : index
      %c0_42 = arith.constant 0 : index
      %65 = vector.load %arg12[%c0_41, %c0_42] : memref<1x32xf32, #tpu.memory_space<vmem>>, vector<1x32xf32>
      %c0_43 = arith.constant 0 : index
      %c0_44 = arith.constant 0 : index
      %66 = vector.load %arg13[%c0_43, %c0_44] : memref<1x32xf32, #tpu.memory_space<vmem>>, vector<1x32xf32>
      %cst_45 = arith.constant dense<0.000000e+00> : vector<8xf32>
      %67 = vector.multi_reduction <add>, %64, %cst_45 [1] : vector<8x32xf32> to vector<8xf32>
      %68 = vector.shape_cast %67 : vector<8xf32> to vector<8x1xf32>
      %cst_46 = arith.constant 3.200000e+01 : f32
      %69 = vector.broadcast %cst_46 : f32 to vector<8x1xf32>
      %70 = arith.divf %68, %69 : vector<8x1xf32>
      %71 = vector.broadcast %70 : vector<8x1xf32> to vector<8x32xf32>
      %72 = arith.subf %64, %71 : vector<8x32xf32>
      %73 = arith.mulf %72, %72 : vector<8x32xf32>
      %cst_47 = arith.constant dense<0.000000e+00> : vector<8xf32>
      %74 = vector.multi_reduction <add>, %73, %cst_47 [1] : vector<8x32xf32> to vector<8xf32>
      %75 = vector.shape_cast %74 : vector<8xf32> to vector<8x1xf32>
      %cst_48 = arith.constant 3.200000e+01 : f32
      %76 = vector.broadcast %cst_48 : f32 to vector<8x1xf32>
      %77 = arith.divf %75, %76 : vector<8x1xf32>
      %78 = vector.broadcast %70 : vector<8x1xf32> to vector<8x32xf32>
      %79 = arith.subf %64, %78 : vector<8x32xf32>
      %cst_49 = arith.constant 9.99999974E-6 : f32
      %80 = vector.broadcast %cst_49 : f32 to vector<8x1xf32>
      %81 = arith.addf %77, %80 : vector<8x1xf32>
      %82 = math.rsqrt %81 : vector<8x1xf32>
      %83 = vector.broadcast %82 : vector<8x1xf32> to vector<8x32xf32>
      %84 = arith.mulf %79, %83 : vector<8x32xf32>
      %85 = vector.broadcast %65 : vector<1x32xf32> to vector<8x32xf32>
      %86 = arith.mulf %84, %85 : vector<8x32xf32>
      %87 = vector.broadcast %66 : vector<1x32xf32> to vector<8x32xf32>
      %88 = arith.addf %86, %87 : vector<8x32xf32>
      %89 = arith.truncf %88 : vector<8x32xf32> to vector<8x32xbf16>
      %c0_50 = arith.constant 0 : index
      %c0_51 = arith.constant 0 : index
      %90 = vector.load %arg14[%c0_50, %c0_51] : memref<32x64xbf16, #tpu.memory_space<vmem>>, vector<32x64xbf16>
      %cst_52 = arith.constant dense<0.000000e+00> : vector<8x64xf32>
      %91 = tpu.matmul %89, %90, %cst_52 {dimension_numbers = #tpu.dot_dimension_numbers<[1], [0], [0], [1], [0, 0, 1, 1], [], []>} : vector<8x32xbf16>, vector<32x64xbf16>, vector<8x64xf32> -> vector<8x64xf32>
      %c0_53 = arith.constant 0 : index
      %c0_54 = arith.constant 0 : index
      %92 = vector.load %arg15[%c0_53, %c0_54] : memref<1x64xf32, #tpu.memory_space<vmem>>, vector<1x64xf32>
      %93 = vector.broadcast %92 : vector<1x64xf32> to vector<8x64xf32>
      %94 = arith.addf %91, %93 : vector<8x64xf32>
      %cst_55 = arith.constant 0.000000e+00 : f32
      %95 = vector.broadcast %cst_55 : f32 to vector<8x64xf32>
      %96 = arith.maximumf %94, %95 : vector<8x64xf32>
      %97 = arith.truncf %96 : vector<8x64xf32> to vector<8x64xbf16>
      %c0_56 = arith.constant 0 : index
      %c0_57 = arith.constant 0 : index
      %98 = vector.load %arg16[%c0_56, %c0_57] : memref<64x32xbf16, #tpu.memory_space<vmem>>, vector<64x32xbf16>
      %cst_58 = arith.constant dense<0.000000e+00> : vector<8x32xf32>
      %99 = tpu.matmul %97, %98, %cst_58 {dimension_numbers = #tpu.dot_dimension_numbers<[1], [0], [0], [1], [0, 0, 1, 1], [], []>} : vector<8x64xbf16>, vector<64x32xbf16>, vector<8x32xf32> -> vector<8x32xf32>
      %c0_59 = arith.constant 0 : index
      %c0_60 = arith.constant 0 : index
      %100 = vector.load %arg17[%c0_59, %c0_60] : memref<1x32xf32, #tpu.memory_space<vmem>>, vector<1x32xf32>
      %101 = vector.broadcast %100 : vector<1x32xf32> to vector<8x32xf32>
      %102 = arith.addf %99, %101 : vector<8x32xf32>
      %103 = arith.addf %88, %102 : vector<8x32xf32>
      %c0_61 = arith.constant 0 : index
      %c0_62 = arith.constant 0 : index
      %104 = vector.load %arg18[%c0_61, %c0_62] : memref<1x32xf32, #tpu.memory_space<vmem>>, vector<1x32xf32>
      %c0_63 = arith.constant 0 : index
      %c0_64 = arith.constant 0 : index
      %105 = vector.load %arg19[%c0_63, %c0_64] : memref<1x32xf32, #tpu.memory_space<vmem>>, vector<1x32xf32>
      %cst_65 = arith.constant dense<0.000000e+00> : vector<8xf32>
      %106 = vector.multi_reduction <add>, %103, %cst_65 [1] : vector<8x32xf32> to vector<8xf32>
      %107 = vector.shape_cast %106 : vector<8xf32> to vector<8x1xf32>
      %cst_66 = arith.constant 3.200000e+01 : f32
      %108 = vector.broadcast %cst_66 : f32 to vector<8x1xf32>
      %109 = arith.divf %107, %108 : vector<8x1xf32>
      %110 = vector.broadcast %109 : vector<8x1xf32> to vector<8x32xf32>
      %111 = arith.subf %103, %110 : vector<8x32xf32>
      %112 = arith.mulf %111, %111 : vector<8x32xf32>
      %cst_67 = arith.constant dense<0.000000e+00> : vector<8xf32>
      %113 = vector.multi_reduction <add>, %112, %cst_67 [1] : vector<8x32xf32> to vector<8xf32>
      %114 = vector.shape_cast %113 : vector<8xf32> to vector<8x1xf32>
      %cst_68 = arith.constant 3.200000e+01 : f32
      %115 = vector.broadcast %cst_68 : f32 to vector<8x1xf32>
      %116 = arith.divf %114, %115 : vector<8x1xf32>
      %117 = vector.broadcast %109 : vector<8x1xf32> to vector<8x32xf32>
      %118 = arith.subf %103, %117 : vector<8x32xf32>
      %cst_69 = arith.constant 9.99999974E-6 : f32
      %119 = vector.broadcast %cst_69 : f32 to vector<8x1xf32>
      %120 = arith.addf %116, %119 : vector<8x1xf32>
      %121 = math.rsqrt %120 : vector<8x1xf32>
      %122 = vector.broadcast %121 : vector<8x1xf32> to vector<8x32xf32>
      %123 = arith.mulf %118, %122 : vector<8x32xf32>
      %124 = vector.broadcast %104 : vector<1x32xf32> to vector<8x32xf32>
      %125 = arith.mulf %123, %124 : vector<8x32xf32>
      %126 = vector.broadcast %105 : vector<1x32xf32> to vector<8x32xf32>
      %127 = arith.addf %125, %126 : vector<8x32xf32>
      %128 = arith.truncf %127 : vector<8x32xf32> to vector<8x32xbf16>
      %c0_70 = arith.constant 0 : index
      %c0_71 = arith.constant 0 : index
      %c0_72 = arith.constant 0 : index
      %129 = vector.load %arg20[%c0_70, %c0_71, %c0_72] : memref<1x8x32xbf16, #tpu.memory_space<vmem>>, vector<1x8x32xbf16>
      %130 = vector.shape_cast %129 : vector<1x8x32xbf16> to vector<8x32xbf16>
      %131 = vector.shape_cast %128 : vector<8x32xbf16> to vector<1x8x32xbf16>
      tpu.vector_store %arg20[%c0_70, %c0_71, %c0_72], %131 {strides = array<i32>} : memref<1x8x32xbf16, #tpu.memory_space<vmem>>, vector<1x8x32xbf16>,
    } else {
    }
    return
  }
  func.func @transform_0(%arg0: i32, %arg1: i32, %arg2: memref<2xi32, #tpu.memory_space<smem>>) -> (i32, i32, i32) {
    %c0_i32 = arith.constant 0 : i32
    %c0_i32_0 = arith.constant 0 : i32
    %c0_i32_1 = arith.constant 0 : i32
    return %arg0, %c0_i32, %c0_i32_0 : i32, i32, i32
  }
  func.func @transform_1(%arg0: i32, %arg1: i32, %arg2: memref<2xi32, #tpu.memory_space<smem>>) -> (i32, i32, i32) {
    %c0_i32 = arith.constant 0 : i32
    %c0_i32_0 = arith.constant 0 : i32
    %c0_i32_1 = arith.constant 0 : i32
    return %arg1, %c0_i32, %c0_i32_0 : i32, i32, i32
  }
  func.func @transform_2(%arg0: i32, %arg1: i32, %arg2: memref<2xi32, #tpu.memory_space<smem>>) -> (i32, i32, i32) {
    %c0_i32 = arith.constant 0 : i32
    %c0_i32_0 = arith.constant 0 : i32
    %c0_i32_1 = arith.constant 0 : i32
    return %arg1, %c0_i32, %c0_i32_0 : i32, i32, i32
  }
  func.func @transform_3(%arg0: i32, %arg1: i32, %arg2: memref<2xi32, #tpu.memory_space<smem>>) -> (i32, i32, i32) {
    %c0_i32 = arith.constant 0 : i32
    %c0_i32_0 = arith.constant 0 : i32
    %c0_i32_1 = arith.constant 0 : i32
    return %arg1, %c0_i32, %c0_i32_0 : i32, i32, i32
  }
  func.func @transform_4(%arg0: i32, %arg1: i32, %arg2: memref<2xi32, #tpu.memory_space<smem>>) -> (i32, i32, i32) {
    %c0_i32 = arith.constant 0 : i32
    %c0_i32_0 = arith.constant 0 : i32
    %c0_i32_1 = arith.constant 0 : i32
    return %arg1, %c0_i32, %c0_i32_0 : i32, i32, i32
  }
  func.func @transform_5(%arg0: i32, %arg1: i32, %arg2: memref<2xi32, #tpu.memory_space<smem>>) -> (i32, i32, i32) {
    %c0_i32 = arith.constant 0 : i32
    %c0_i32_0 = arith.constant 0 : i32
    %c0_i32_1 = arith.constant 0 : i32
    return %arg1, %c0_i32, %c0_i32_0 : i32, i32, i32
  }
  func.func @transform_6(%arg0: i32, %arg1: i32, %arg2: memref<2xi32, #tpu.memory_space<smem>>) -> (i32, i32, i32) {
    %c0_i32 = arith.constant 0 : i32
    %c0_i32_0 = arith.constant 0 : i32
    %c0_i32_1 = arith.constant 0 : i32
    return %arg1, %c0_i32, %c0_i32_0 : i32, i32, i32
  }
  func.func @transform_7(%arg0: i32, %arg1: i32, %arg2: memref<2xi32, #tpu.memory_space<smem>>) -> (i32, i32, i32) {
    %c0_i32 = arith.constant 0 : i32
    %c0_i32_0 = arith.constant 0 : i32
    %c0_i32_1 = arith.constant 0 : i32
    return %arg1, %c0_i32, %c0_i32_0 : i32, i32, i32
  }
  func.func @transform_8(%arg0: i32, %arg1: i32, %arg2: memref<2xi32, #tpu.memory_space<smem>>) -> (i32, i32) {
    %c0_i32 = arith.constant 0 : i32
    %c0_i32_0 = arith.constant 0 : i32
    %c0_i32_1 = arith.constant 0 : i32
    return %c0_i32, %c0_i32_0 : i32, i32
  }
  func.func @transform_9(%arg0: i32, %arg1: i32, %arg2: memref<2xi32, #tpu.memory_space<smem>>) -> (i32, i32) {
    %c0_i32 = arith.constant 0 : i32
    %c0_i32_0 = arith.constant 0 : i32
    %c0_i32_1 = arith.constant 0 : i32
    return %c0_i32, %c0_i32_0 : i32, i32
  }
  func.func @transform_10(%arg0: i32, %arg1: i32, %arg2: memref<2xi32, #tpu.memory_space<smem>>) -> (i32, i32) {
    %c0_i32 = arith.constant 0 : i32
    %c0_i32_0 = arith.constant 0 : i32
    %c0_i32_1 = arith.constant 0 : i32
    return %c0_i32, %c0_i32_0 : i32, i32
  }
  func.func @transform_11(%arg0: i32, %arg1: i32, %arg2: memref<2xi32, #tpu.memory_space<smem>>) -> (i32, i32) {
    %c0_i32 = arith.constant 0 : i32
    %c0_i32_0 = arith.constant 0 : i32
    %c0_i32_1 = arith.constant 0 : i32
    return %c0_i32, %c0_i32_0 : i32, i32
  }
  func.func @transform_12(%arg0: i32, %arg1: i32, %arg2: memref<2xi32, #tpu.memory_space<smem>>) -> (i32, i32) {
    %c0_i32 = arith.constant 0 : i32
    %c0_i32_0 = arith.constant 0 : i32
    %c0_i32_1 = arith.constant 0 : i32
    return %c0_i32, %c0_i32_0 : i32, i32
  }
  func.func @transform_13(%arg0: i32, %arg1: i32, %arg2: memref<2xi32, #tpu.memory_space<smem>>) -> (i32, i32) {
    %c0_i32 = arith.constant 0 : i32
    %c0_i32_0 = arith.constant 0 : i32
    %c0_i32_1 = arith.constant 0 : i32
    return %c0_i32, %c0_i32_0 : i32, i32
  }
  func.func @transform_14(%arg0: i32, %arg1: i32, %arg2: memref<2xi32, #tpu.memory_space<smem>>) -> (i32, i32) {
    %c0_i32 = arith.constant 0 : i32
    %c0_i32_0 = arith.constant 0 : i32
    %c0_i32_1 = arith.constant 0 : i32
    return %c0_i32, %c0_i32_0 : i32, i32
  }
  func.func @transform_15(%arg0: i32, %arg1: i32, %arg2: memref<2xi32, #tpu.memory_space<smem>>) -> (i32, i32) {
    %c0_i32 = arith.constant 0 : i32
    %c0_i32_0 = arith.constant 0 : i32
    %c0_i32_1 = arith.constant 0 : i32
    return %c0_i32, %c0_i32_0 : i32, i32
  }
  func.func @transform_16(%arg0: i32, %arg1: i32, %arg2: memref<2xi32, #tpu.memory_space<smem>>) -> (i32, i32) {
    %c0_i32 = arith.constant 0 : i32
    %c0_i32_0 = arith.constant 0 : i32
    %c0_i32_1 = arith.constant 0 : i32
    return %c0_i32, %c0_i32_0 : i32, i32
  }
  func.func @transform_17(%arg0: i32, %arg1: i32, %arg2: memref<2xi32, #tpu.memory_space<smem>>) -> (i32, i32, i32) {
    %c0_i32 = arith.constant 0 : i32
    %c0_i32_0 = arith.constant 0 : i32
    %c0_i32_1 = arith.constant 0 : i32
    return %arg0, %c0_i32, %c0_i32_0 : i32, i32, i32
  }
}

</mosaic_0001>

<bundles_post_ra>
// kernel: tpu_custom_call.1
= control target key start
LH: loop header
LB: loop body
LE: loop exit
PB: predicated region body
PF: predicated region fallthrough
CT: control target
= control target key end

     0   :  { %s2149_s0 = inlined_call_operand.vmem [shape: s32[2], index: 0, kind: input, shape index: {}]   ;;  %s2150_s1 = inlined_call_operand.vmem [shape: bf16[2,8,32], index: 1, kind: input, shape index: {}]   ;;  %s2151_s2 = inlined_call_operand.vmem [shape: bf16[2,32,16], index: 2, kind: input, shape index: {}]   ;;  %s2152_s3 = inlined_call_operand.vmem [shape: bf16[2,32,16], index: 3, kind: input, shape index: {}]   ;;  %s2153_s4 = inlined_call_operand.vmem [shape: bf16[2,32,16], index: 4, kind: input, shape index: {}]   ;;  %s2154_s5 = inlined_call_operand.vmem [shape: f32[2,1,16], index: 5, kind: input, shape index: {}]   ;;  %s2155_s6 = inlined_call_operand.vmem [shape: f32[2,1,16], index: 6, kind: input, shape index: {}]   ;;  %s2156_s7 = inlined_call_operand.vmem [shape: f32[2,1,16], index: 7, kind: input, shape index: {}]   ;;  %s2157_s8 = inlined_call_operand.vmem [shape: bf16[2,16,32], index: 8, kind: input, shape index: {}]   ;;  %s2158_s9 = inlined_call_operand.vmem [shape: f32[1,32], index: 9, kind: input, shape index: {}]   ;;  %s2159_s10 = inlined_call_operand.vmem [shape: f32[1,32], index: 10, kind: input, shape index: {}]   ;;  %s2160_s11 = inlined_call_operand.vmem [shape: f32[1,32], index: 11, kind: input, shape index: {}]   ;;  %s2161_s12 = inlined_call_operand.vmem [shape: bf16[32,64], index: 12, kind: input, shape index: {}]   ;;  %s2162_s13 = inlined_call_operand.vmem [shape: f32[1,64], index: 13, kind: input, shape index: {}]   ;;  %s2163_s14 = inlined_call_operand.vmem [shape: bf16[64,32], index: 14, kind: input, shape index: {}]   ;;  %s2164_s15 = inlined_call_operand.vmem [shape: f32[1,32], index: 15, kind: input, shape index: {}]   ;;  %s2165_s16 = inlined_call_operand.vmem [shape: f32[1,32], index: 16, kind: input, shape index: {}]   ;;  %s2166_s17 = inlined_call_operand.vmem [shape: f32[1,32], index: 17, kind: input, shape index: {}]   ;;  %s2167_s18 = inlined_call_operand.hbm [shape: bf16[2,8,32], index: 18, kind: output, shape index: {}]  }
   0x1   :  { %2181 = sst [smem:[#allocation20_spill]] %s2149_s0 }
   0x2   :  { %2182 = sst [smem:[#allocation21_spill]] %s2150_s1 }
   0x3   :  { %2183 = sst [smem:[#allocation22_spill]] %s2151_s2 }
   0x4   :  { %2184 = sst [smem:[#allocation23_spill]] %s2152_s3 }
   0x5   :  { %2185 = sst [smem:[#allocation24_spill]] %s2159_s10 }
   0x6   :  { %2186 = sst [smem:[#allocation25_spill]] %s2160_s11 }
   0x7   :  { %2187 = sst [smem:[#allocation26_spill]] %s2162_s13 }
   0x8   :  { %2188 = sst [smem:[#allocation27_spill]] %s2164_s15 }
   0x9   :  { %2189 = sst [smem:[#allocation28_spill]] %s2165_s16 }
   0xa   :  { %2190 = sst [smem:[#allocation29_spill]] %s2166_s17 }
   0xb   :  { %2191 = sst [smem:[#allocation30_spill]] %s2167_s18 }
   0xc   :  { %s2192_s29 = sld [smem:[#allocation20_spill]] }
  0x12   :  { %s23_s11 = sshll.u32 %s2192_s29, 4  ;;  %s24_s11 = int_to_ptr.vmem [resolvable:$true] %s23_s11 }
  0x13   :  { %s1685_s30 = scalar_lea.vmem %s24_s11, 16  ;;  %p1690_p1 = scmp.lt.s32.totalorder %s24_s11, %s24_s11 }
  0x14   :  { %p1686_p0 = scmp.ne.s32.totalorder %s24_s11, %s1685_s30  ;;  %p1691_p2 = scmp.lt.s32.totalorder %s1685_s30, %s1685_s30 }
  0x16   :  { %p1692_p3 = por %p1691_p2, %p1690_p1 }
  0x18   :  { %p1693_p4 = pnand %p1692_p3, %p1686_p0 }
  0x1a   :  { %1696 = shalt.err (!%p1693_p4)  }
  0x1b   :  { %s1793_s0 = smov [#allocation4]  }
  0x1c   :  { %26 = dma.vmem_to_smem %s24_s11, 16, %s1793_s0, [#allocation3] }
  0x1d   :  { %1755 = dma.done.wait [#allocation3], 16 }
  0x1e   :  { %1756 = vsyncadd [#allocation3], 4294967280 }
  0x1f   :  { %28 = sfence }
  0x20   :  { %29 = vsyncpa [#allocation6], 0 }
  0x21   :  { %31 = vsyncpa [#allocation6 + $0x1], 0  ;;  %s1898_s19 = smov 0   ;;  %s1900_s1 = smov 0  }
  0x22   :  { %s1902_s20 = smov 0   ;;  %s1904_s21 = smov 0  }
  0x23   :  { %s1906_s22 = smov 0   ;;  %s1908_s2 = smov 0  }
  0x24   :  { %s1910_s23 = smov 0   ;;  %s1912_s11 = smov 0  }
  0x25 LB: > { %2193 = sst [smem:[#allocation9_spill]] %s1763_s19  ;;  %s1446_s24 = sadd.s32 4294967295, %s1791_s11   ;;  %s1791_s11 = sphi %s1912_s11, %s37_s11   ;;  %s1787_s23 = sphi %s1910_s23, %s2228_s23   ;;  %s1783_s2 = sphi %s1908_s2, %s2227_s2   ;;  %s1779_s22 = sphi %s1906_s22, %s2226_s22   ;;  %s1775_s21 = sphi %s1904_s21, %s2225_s21   ;;  %s1771_s20 = sphi %s1902_s20, %s2224_s20   ;;  %s1767_s1 = sphi %s1900_s1, %s2223_s1   ;;  %s1763_s19 = sphi %s1898_s19, %s2222_s19  }
  0x26   : > { %2194 = sst [smem:[#allocation10_spill]] %s1767_s1  ;;  %s1447_s25 = sadd.s32 4294967294, %s1791_s11  }
  0x27   : > { %2195 = sst [smem:[#allocation11_spill]] %s1771_s20  ;;  %s46_s26 = sadd.s32 1, %s1783_s2 }
  0x28   : > { %2196 = sst [smem:[#allocation12_spill]] %s1783_s2  ;;  %p47_p5 = scmp.ge.s32.totalorder %s46_s26, 2 }
  0x29   : > { %2197 = sst [smem:[#allocation13_spill]] %s1787_s23  ;;  %s49_s27 = sadd.s32 1, %s1787_s23 }
  0x2a   : > { %2198 = sst [smem:[#allocation14_spill]] %s1791_s11  ;;  %p463_p6 = scmp.ne.s32.totalorder %s1771_s20, %s1767_s1 }
  0x2b   : > { %p464_p7 = scmp.eq.s32.totalorder %s1446_s24, 3  ;;  %s2230_s26 = smov (%p47_p5, %s46_s26), 0 }
  0x2c   : > { %2199 = sst [smem:[#allocation15_spill]] %s2230_s26  ;;  %s2232_s27 = smov (!%p47_p5, %s49_s27), %s1787_s23 }
  0x2d   : > { %p1947_p8 = por %p464_p7, %p463_p6  ;;  %p469_p9 = scmp.ne.s32.totalorder %s1767_s1, %s1763_s19 }
  0x2e   : > { %p51_p10 = scmp.ge.s32.totalorder %s2232_s27, 2  ;;  %p470_p11 = scmp.eq.s32.totalorder %s1447_s25, 3 }
  0x2f   : > { %s2200_s28 = scalar_select %p1947_p8, 1, 0 }
  0x30   : > { %p1450_p12 = scmp.ge.s32.totalorder %s1791_s11, 1  ;;  %p572_p13 = scmp.lt.s32.totalorder %s1791_s11, 5 }
  0x31   : > { %2201 = sst [smem:[#allocation16_spill]] %s2200_s28  ;;  %s2234_s27 = smov (%p51_p10, %s2232_s27), 0 }
  0x32   : > { %2202 = sst [smem:[#allocation17_spill]] %s2234_s27  ;;  %p1957_p0 = por %p470_p11, %p469_p9 }
  0x33   : > { %p573_p1 = pnand %p1450_p12, %p572_p13  ;;  %s450_s30 = ssub.s32 %s1787_s23, %s2234_s27 }
  0x34   : > { %s2203_s29 = scalar_select %p1957_p0, 1, 0 }
  0x35   : > { %s453_s0 = sadd.s32 1, %s1771_s20  ;;  %p451_p2 = scmp.eq.s32.totalorder %s450_s30, 0 }
  0x36   : > { %2204 = sst [smem:[#allocation18_spill]] %s2203_s29  ;;  %576 = sbr.rel (%p573_p1) target bundleno = 2241 (0x8c1), region = 88 }
  0x37   : > { %s1965_s24 = scalar_select %p451_p2, %s1771_s20, %s453_s0  }
  0x38   : > { %s2176_s25 = sand.u32 (!%p573_p1), 1, %s1767_s1   ;;  %p652_p3 = scmp.lt.s32.totalorder (!%p573_p1), %s1779_s22, 1 }
  0x39   : > { %2205 = sst [smem:[#allocation19_spill]] %s1965_s24  ;;  %s1971_s26 = sshll.u32 (!%p573_p1), %s2176_s25, 2 }
  0x3a   : > { %p656_p4 = scmp.lt.s32.totalorder (!%p573_p1), %s1775_s21, 1  ;;  %s2206_s24 = sld [smem:[#allocation21_spill]] (!%p573_p1) }
  0x3b   : > { %s653_s2 = scalar_select %p652_p3, %s1779_s22, 1 }
  0x3c   : > { %s1976_s27 = scalar_select %p656_p4, %s1775_s21, 1 }
  0x3d   : > { %s1452_s30 = sshll.u32 %s653_s2, 2  ;;  %s2207_s25 = sld [smem:[#allocation22_spill]] }
  0x3e   : > { %s1498_s29 = sshll.u32 %s1976_s27, 4  ;;  %s2208_s3 = sld [smem:[#allocation23_spill]] }
  0x3f   : > { %s1993_s13 = scalar_lea.vmem %s2153_s4, %s1498_s29  ;;  %s673_s23 = scalar_lea.vmem %s2154_s5, %s1976_s27 }
  0x40   : > { %s655_s20 = scalar_lea.vmem %s2206_s24, %s1452_s30  ;;  %s676_s19 = scalar_lea.vmem %s2155_s6, %s1976_s27 }
  0x41   : > { %v1988_v0 = vld [vmem:[%s655_s20] sm:$0xf]  ;;  %s679_s1 = scalar_lea.vmem %s2156_s7, %s1976_s27  ;;  %s1501_s28 = sshll.u32 %s1976_s27, 3 }
  0x42   : > { %s651_s15 = scalar_lea.vmem [#allocation5], %s1971_s26  ;;  %p1461_p5 = scmp.ne.s32.totalorder %s1775_s21, 0 }
  0x43   : > { %s660_s18 = scalar_lea.vmem %s2207_s25, %s1498_s29 }
  0x44   : > { %s665_s17 = scalar_lea.vmem %s2208_s3, %s1498_s29  ;;  %s2011_s3 = scalar_lea.vmem %s2157_s8, %s1501_s28 }
  0x45   : > { %690 = sbr.rel (%p1461_p5) target bundleno = 76 (0x4c), region = 92 }
  0x4a   : > { %vm691_vm0 = vcmask 261120   ;;  %v1794_v1 = vmov 0.0  }
  0x4b   : > { %692 = vst.msk [vmem:[#allocation2] sm:$0xff] %vm691_vm0, %v1794_v1 }
  0x4c PF: > { %v1664_v2 = vld [vmem:[%s665_s17 + $0x8] sm:$0xff]   ;;  %v1795_v3 = vmov 0.0   ;;  %v1666_v5 = vld [vmem:[%s665_s17] sm:$0xff]   ;;  %vm1796_vm1 = vmmov 0   ;;  %vm716_vm2 = vcmask 261120   ;;  %vm889_vm3 = vcmask 130048  }
  0x4d   : > { %1533 = vmatprep.subr.bf16.mxu1 %v1795_v3  ;;  %1525 = vmatprep.subr.bf16.mxu0 %v1795_v3  ;;  %v1665_v4 = vld [vmem:[%s660_s18 + $0x8] sm:$0xff]   ;;  %v1667_v6 = vld [vmem:[%s660_s18] sm:$0xff]   ;;  %s936_s29 = sld [smem:[#allocation4 + %s1779_s22]]  ;;  %v937_v24 = vlaneseq  ;;  %vm942_vm5 = vcmask 64512   ;;  %vm958_vm6 = vcmask 1043456   ;;  %p1478_p6 = scmp.ne.s32.totalorder %s1775_s21, 1 }
  0x4e   : > { %1534 = vmatpush3.bf16.msra.mxu1 %v1664_v2  ;;  %1537 = vmatprep.mubr.msk.bf16.mxu1 %vm1796_vm1, %v1795_v3  ;;  %v1466_v7 = vld [vmem:[%s676_s19] ss:$0 sm:$0xff]  ;;  %v1668_v22 = vld [vmem:[%s1993_s13 + $0x8] sm:$0xff]   ;;  %s2209_s0 = sld [smem:[#allocation24_spill]] (!%p1478_p6) }
  0x4f   : > { %1526 = vmatpush3.bf16.msra.mxu0 %v1665_v4  ;;  %1535 = vmatprep.subr.bf16.mxu1 %v1795_v3  ;;  %v1462_v12 = vld [vmem:[%s673_s23] ss:$0 sm:$0xff]  ;;  %v938_v25 = vand.u32 127, %v937_v24  ;;  %s2210_s17 = sld [smem:[#allocation25_spill]] (!%p1478_p6) }
  0x50   : > { %1527 = vmatprep.subr.bf16.mxu0 %v1795_v3  ;;  %1529 = vmatprep.mubr.msk.bf16.mxu0 %vm1796_vm1, %v1795_v3  ;;  %v1669_v23 = vld [vmem:[%s1993_s13] sm:$0xff]   ;;  %s2211_s21 = sld [smem:[#allocation26_spill]] (!%p1478_p6) }
  0x51   : > { %v1470_v38 = vld [vmem:[%s679_s1] ss:$0 sm:$0xff]  ;;  %s2212_s30 = sld [smem:[#allocation27_spill]] (!%p1478_p6) }
  0x52   : > { %1536 = vmatpush3.bf16.msra.mxu1 %v1666_v5  ;;  %v1670_v46 = vld [vmem:[%s2011_s3] sm:$0xff]   ;;  %s2213_s25 = sld [smem:[#allocation28_spill]] (!%p1478_p6) }
  0x53   : > { %1528 = vmatpush3.bf16.msra.mxu0 %v1667_v6  ;;  %1549 = vmatprep.subr.bf16.mxu1 %v1795_v3  ;;  %v939_v26 = vstv %s936_s29  ;;  %v1002_v56 = vld [vmem:[#allocation2] sm:$0xff]  ;;  %s2214_s20 = sld [smem:[#allocation29_spill]] (!%p1478_p6) }
  0x54   : > { %1541 = vmatprep.subr.bf16.mxu0 %v1795_v3  ;;  %vm940_vm4 = vcmp.lt.s32.totalorder %v938_v25, %v939_v26 }
  0x55   : > { %1538 = vmatmul.mubr.msk.bf16.vlgmr.msra.gmra.mxu1 %vm716_vm2, %v1988_v0 }
  0x56   : > { %1530 = vmatmul.mubr.msk.bf16.vlgmr.msra.gmra.mxu0 %vm716_vm2, %v1988_v0  ;;  %1551 = vmatprep.mubr.msk.bf16.mxu1 %vm1796_vm1, %v1795_v3 }
  0x57   : > { %1545 = vmatprep.mubr.msk.bf16.mxu0 %vm1796_vm1, %v1795_v3  ;;  %1542 = vmatpush3.bf16.msra.mxu0 %v1668_v22 }
  0x58   : > { %1543 = vmatprep.subr.bf16.mxu0 %v1795_v3 }
  0x5b   : > { %1544 = vmatpush3.bf16.msra.mxu0 %v1669_v23 }
  0x5c   : > { %1555 = vmatprep.subr.bf16.mxu0 %v1795_v3 }
  0x5e   : > { %1546 = vmatmul.mubr.msk.bf16.vlgmr.msra.gmra.mxu0 %vm716_vm2, %v1988_v0 }
  0x5f   : > { %1557 = vmatprep.mubr.msk.bf16.mxu0 %vm1796_vm1, %v1795_v3 }
 0x115   : > { %v818_v8 = vpop.f32.mrf.mxu1 }
 0x116   : > { %v819_v9 = vadd.f32 %v1466_v7, %v818_v8  ;;  %v754_v10 = vpop.f32.mrf.mxu0 }
 0x117   : > { %v1539_v11 = vpop.f32.mrf.mxu1  ;;  %v755_v17 = vadd.f32 %v1462_v12, %v754_v10 }
 0x118   : > { %v824_v13 = vpack.c.bf16 %v819_v9, %v819_v9  ;;  %v1531_v14 = vpop.f32.mrf.mxu0 }
 0x119   : > { %v821_v15 = vpop.f32.mrf.mxu1  ;;  %v760_v21 = vpack.c.bf16 %v755_v17, %v755_v17 }
 0x11a   : > { %v894_v16 = vsel %vm889_vm3, %v824_v13, 0  ;;  %v757_v18 = vpop.f32.mrf.mxu0 }
 0x11b   : > { %v1540_v19 = vpop.f32.mrf.mxu1  ;;  %1550 = vmatpush3.bf16.xpose.msra.mxu1 %v894_v16 }
 0x11c   : > { %v1532_v20 = vpop.f32.mrf.mxu0  ;;  %1561 = vmatprep.subr.bf16.mxu1 %v1795_v3 }
 0x11e   : > { %v882_v39 = vpop.f32.mrf.mxu0 }
 0x11f   : > { %v883_v40 = vadd.f32 %v1470_v38, %v882_v39 }
 0x120   : > { %v1547_v41 = vpop.f32.mrf.mxu0 }
 0x121   : > { %v888_v42 = vpack.c.bf16 %v883_v40, %v883_v40 }
 0x122   : > { %1552 = vmatmul.mubr.msk.bf16.vlgmr.msra.gmra.mxu1 %vm889_vm3, %v760_v21  ;;  %v885_v43 = vpop.f32.mrf.mxu0 }
 0x123   : > { %1563 = vmatprep.mubr.msk.bf16.mxu1 %vm1796_vm1, %v1795_v3  ;;  %v960_v44 = vsel %vm958_vm6, %v888_v42, 0  ;;  %1562 = vmatpush3.bf16.msra.mxu1 %v1670_v46 }
 0x124   : > { %v1548_v45 = vpop.f32.mrf.mxu0  ;;  %1556 = vmatpush3.bf16.msra.mxu0 %v960_v44 }
 0x1e2   : > { %v930_v27 = vpop.f32.mrf.mxu1 }
 0x1e3   : > { %v941_v28 = vsel %vm940_vm4, %v930_v27, -1000000.0 }
 0x1e4   : > { %v1553_v29 = vpop.f32.mrf.mxu1  ;;  %v943_v30 = vsel %vm942_vm5, %v941_v28, -inf }
 0x1e5   : > { %944 = vmax.xlane.f32.xlu0 %v943_v30 }
 0x1e6   : > { %v933_v31 = vpop.f32.mrf.mxu1 }
 0x1e8   : > { %v1554_v32 = vpop.f32.mrf.mxu1 }
 0x26e   : > { %v945_v33 = vpop.xlane.xlu0 %944 }
 0x26f   : > { %v946_v34 = vsub.f32 %v941_v28, %v945_v33 }
 0x271   : > { %v947_v35 = vmul.f32 1.442695, %v946_v34 }
 0x273   : > { %1671 = vpow2.f32 %v947_v35 }
 0x280   : > { %v1672_v36 = vpop.eup %1671 }
 0x281   : > { %v949_v37 = vsel %vm942_vm5, %v1672_v36, 0.0 }
 0x282   : > { %950 = vadd.xlane.f32.xlu0 %v949_v37 }
 0x30b   : > { %v951_v47 = vpop.xlane.xlu0 %950 }
 0x30c   : > { %1673 = vrcp.f32 %v951_v47 }
 0x319   : > { %v1674_v48 = vpop.eup %1673 }
 0x31a   : > { %v953_v49 = vmul.f32 %v1674_v48, %v1672_v36 }
 0x31c   : > { %v954_v50 = vpack.c.bf16 %v953_v49, %v953_v49 }
 0x31e   : > { %1558 = vmatmul.mubr.msk.bf16.vlgmr.msra.gmra.mxu0 %vm942_vm5, %v954_v50 }
 0x3de   : > { %v996_v51 = vpop.f32.mrf.mxu0 }
 0x3df   : > { %v1003_v52 = vpack.c.bf16 %v996_v51, %v996_v51 }
 0x3e0   : > { %v1559_v53 = vpop.f32.mrf.mxu0 }
 0x3e1   : > { %1564 = vmatmul.mubr.msk.bf16.vlgmr.msra.gmra.mxu1 %vm889_vm3, %v1003_v52 }
 0x3e2   : > { %v999_v54 = vpop.f32.mrf.mxu0 }
 0x3e4   : > { %v1560_v55 = vpop.f32.mrf.mxu0 }
 0x4a1   : > { %v1049_v57 = vpop.f32.mrf.mxu1 }
 0x4a2   : > { %v1055_v58 = vadd.f32 %v1049_v57, %v1002_v56 }
 0x4a3   : > { %v1565_v59 = vpop.f32.mrf.mxu1  ;;  %1060 = sbr.rel (%p1478_p6) target bundleno = 2217 (0x8a9), region = 96 }
 0x4a4   : > { %1056 = vst.msk [vmem:[#allocation2] sm:$0xff] %vm716_vm2, %v1055_v58 }
 0x4a5   : > { %v1052_v60 = vpop.f32.mrf.mxu1 }
 0x4a7   : > { %v1566_v61 = vpop.f32.mrf.mxu1 }
 0x4a8   : > { %v1061_v62 = vunpack.c.l.bf16 %v1988_v0  ;;  %v1479_v1 = vld [vmem:[%s2158_s9] ss:$0 sm:$0xff]  ;;  %v1675_v0 = vld [vmem:[%s2161_s12 + $0x8] sm:$0xff]   ;;  %v1797_v10 = vmov 0.0   ;;  %vm1798_vm7 = vmmov 0   ;;  %v1677_v12 = vld [vmem:[%s2163_s14 + $0x18] sm:$0xff]  }
 0x4a9   : > { %1567 = vmatprep.subr.bf16.mxu0 %v1797_v10  ;;  %1571 = vmatprep.mubr.msk.bf16.mxu0 %vm1798_vm7, %v1797_v10  ;;  %v1676_v11 = vld [vmem:[%s2161_s12] sm:$0xff]   ;;  %v1678_v13 = vld [vmem:[%s2163_s14 + $0x10] sm:$0xff]   ;;  %v1679_v24 = vld [vmem:[%s2163_s14 + $0x8] sm:$0xff]   ;;  %vm1210_vm8 = vcmask 523264   ;;  %vm1285_vm9 = vcmask 257024  }
 0x4aa   : > { %1568 = vmatpush3.bf16.msra.mxu0 %v1675_v0  ;;  %1575 = vmatprep.subr.bf16.mxu1 %v1797_v10  ;;  %v1480_v18 = vld [vmem:[%s2209_s0] ss:$0 sm:$0xff] }
 0x4ab   : > { %v1062_v63 = vld [vmem:[#allocation2] sm:$0xff]  ;;  %1569 = vmatprep.subr.bf16.mxu0 %v1797_v10  ;;  %1583 = vmatprep.mubr.msk.bf16.mxu1 %vm1798_vm7, %v1797_v10 }
 0x4ac   : > { %v1063_v2 = vadd.f32 %v1062_v63, %v1061_v62  ;;  %1576 = vmatpush3.bf16.msra.mxu1 %v1677_v12  ;;  %v1481_v20 = vld [vmem:[%s2210_s17] ss:$0 sm:$0xff] }
 0x4ad   : > { %1577 = vmatprep.subr.bf16.mxu1 %v1797_v10  ;;  %v1680_v25 = vld [vmem:[%s2163_s14] sm:$0xff]  }
 0x4ae   : > { %v1071_v3 = vadd.f32 %v1479_v1, %v1063_v2  ;;  %1570 = vmatpush3.bf16.msra.mxu0 %v1676_v11  ;;  %v1482_v26 = vld [vmem:[%s2211_s21] ss:$0 sm:$0xff] }
 0x4af   : > { %v1486_v34 = vld [vmem:[%s2212_s30] ss:$0 sm:$0xff] }
 0x4b0   : > { %v1074_v4 = vsel %vm716_vm2, %v1071_v3, 0.0  ;;  %1578 = vmatpush3.bf16.msra.mxu1 %v1678_v13  ;;  %v1492_v51 = vld [vmem:[%s2213_s25] ss:$0 sm:$0xff] }
 0x4b1   : > { %1075 = vadd.xlane.f32.xlu0 %v1074_v4  ;;  %1579 = vmatprep.subr.bf16.mxu1 %v1797_v10  ;;  %v1493_v53 = vld [vmem:[%s2214_s20] ss:$0 sm:$0xff] }
 0x4b4   : > { %1580 = vmatpush3.bf16.msra.mxu1 %v1679_v24 }
 0x4b5   : > { %1581 = vmatprep.subr.bf16.mxu1 %v1797_v10 }
 0x4b8   : > { %1582 = vmatpush3.bf16.msra.mxu1 %v1680_v25 }
 0x53a   : > { %v1076_v5 = vpop.xlane.xlu0 %1075 }
 0x53b   : > { %v1078_v6 = vmul.f32 0.03125, %v1076_v5 }
 0x53d   : > { %v1079_v7 = vsub.f32 %v1071_v3, %v1078_v6 }
 0x53f   : > { %v1080_v8 = vmul.f32 %v1079_v7, %v1079_v7 }
 0x541   : > { %v1081_v9 = vsel %vm716_vm2, %v1080_v8, 0.0 }
 0x542   : > { %1082 = vadd.xlane.f32.xlu0 %v1081_v9 }
 0x5cb   : > { %v1083_v14 = vpop.xlane.xlu0 %1082 }
 0x5cc   : > { %v1084_v15 = vmul.f32 0.03125, %v1083_v14 }
 0x5ce   : > { %v1085_v16 = vadd.f32 1e-05, %v1084_v15 }
 0x5d0   : > { %1681 = vrsqrt.f32 %v1085_v16 }
 0x5dd   : > { %v1682_v17 = vpop.eup %1681 }
 0x5de   : > { %v1087_v19 = vmul.f32 %v1682_v17, %v1079_v7 }
 0x5e0   : > { %v1094_v21 = vmul.f32 %v1480_v18, %v1087_v19 }
 0x5e2   : > { %v1101_v22 = vadd.f32 %v1481_v20, %v1094_v21 }
 0x5e4   : > { %v1102_v23 = vpack.c.bf16 %v1101_v22, %v1101_v22 }
 0x5e6   : > { %1572 = vmatmul.mubr.msk.bf16.vlgmr.msra.gmra.mxu0 %vm716_vm2, %v1102_v23 }
 0x6a6   : > { %v1163_v27 = vpop.f32.mrf.mxu0 }
 0x6a7   : > { %v1164_v28 = vadd.f32 %v1482_v26, %v1163_v27 }
 0x6a8   : > { %v1573_v29 = vpop.f32.mrf.mxu0 }
 0x6a9   : > { %v1169_v30 = vmax.f32 %v1164_v28, 0.0 }
 0x6aa   : > { %v1166_v31 = vpop.f32.mrf.mxu0 }
 0x6ab   : > { %v1170_v32 = vpack.c.bf16 %v1169_v30, %v1169_v30 }
 0x6ac   : > { %v1574_v33 = vpop.f32.mrf.mxu0 }
 0x6ad   : > { %1584 = vmatmul.mubr.msk.bf16.vlgmr.msra.gmra.mxu1 %vm1210_vm8, %v1170_v32 }
 0x76d   : > { %v1248_v35 = vpop.f32.mrf.mxu1 }
 0x76e   : > { %v1249_v36 = vadd.f32 %v1486_v34, %v1248_v35 }
 0x76f   : > { %v1585_v37 = vpop.f32.mrf.mxu1 }
 0x770   : > { %v1254_v38 = vadd.f32 %v1249_v36, %v1101_v22 }
 0x771   : > { %v1251_v39 = vpop.f32.mrf.mxu1 }
 0x772   : > { %v1257_v40 = vsel %vm716_vm2, %v1254_v38, 0.0 }
 0x773   : > { %1258 = vadd.xlane.f32.xlu1 %v1257_v40  ;;  %v1586_v41 = vpop.f32.mrf.mxu1 }
 0x7fc   : > { %v1259_v42 = vpop.xlane.xlu1 %1258 }
 0x7fd   : > { %v1260_v43 = vmul.f32 0.03125, %v1259_v42 }
 0x7ff   : > { %v1261_v44 = vsub.f32 %v1254_v38, %v1260_v43 }
 0x801   : > { %v1262_v45 = vmul.f32 %v1261_v44, %v1261_v44 }
 0x803   : > { %v1263_v46 = vsel %vm716_vm2, %v1262_v45, 0.0 }
 0x804   : > { %1264 = vadd.xlane.f32.xlu1 %v1263_v46 }
 0x88d   : > { %v1265_v47 = vpop.xlane.xlu1 %1264 }
 0x88e   : > { %v1266_v48 = vmul.f32 0.03125, %v1265_v47 }
 0x890   : > { %v1267_v49 = vadd.f32 1e-05, %v1266_v48 }
 0x892   : > { %1683 = vrsqrt.f32 %v1267_v49 }
 0x89f   : > { %v1684_v50 = vpop.eup %1683 }
 0x8a0   : > { %v1269_v52 = vmul.f32 %v1684_v50, %v1261_v44 }
 0x8a2   : > { %v1276_v54 = vmul.f32 %v1492_v51, %v1269_v52 }
 0x8a4   : > { %v1283_v55 = vadd.f32 %v1493_v53, %v1276_v54 }
 0x8a6   : > { %v1284_v56 = vpack.c.bf16 %v1283_v55, %v1283_v55 }
 0x8a8   : > { %1286 = vst.msk [vmem:[%s651_s15] sm:$0xf] %vm1285_vm9, %v1284_v56 }
 0x8a9 PF: > { %s2215_s0 = sld [smem:[#allocation10_spill]]  ;;  %s1495_s16 = sshll.u32 %s1779_s22, 6 }
 0x8aa   : > { %s2217_s29 = sld [smem:[#allocation30_spill]]  ;;  %s1301_s2 = sshll.u32 %s651_s15, 4  ;;  %s1302_s2 = int_to_ptr.vmem [resolvable:$true] %s1301_s2 }
 0x8ab   : > { %s1697_s21 = scalar_lea.vmem %s1302_s2, 64  ;;  %s1799_s23 = smov [#allocation5]  }
 0x8ac   : > { %p1698_p7 = scmp.ne.s32.totalorder %s1302_s2, %s1697_s21  ;;  %s1701_s24 = sshll.u32 %s1799_s23, 4  ;;  %s1702_s24 = int_to_ptr.vmem [resolvable:$false] %s1701_s24 }
 0x8ad   : > { %s1703_s30 = scalar_lea.vmem %s1702_s24, 128  ;;  %p1704_p11 = scmp.lt.s32.totalorder %s1302_s2, %s1702_s24 }
 0x8ae   : > { %p1699_p9 = pnand %p1698_p7, %p1947_p8  ;;  %p1705_p12 = scmp.lt.s32.totalorder %s1703_s30, %s1697_s21 }
 0x8af   : > { %s2218_s3 = sand.u32 1, %s2215_s0  }
 0x8b0   : > { %s1299_s13 = scalar_lea.hbm %s2217_s29, %s1495_s16  ;;  %s1288_s27 = scalar_lea.sflag [#allocation6], %s2218_s3 }
 0x8b1   : > { %p1700_p10 = pneg %p1699_p9  ;;  %p1706_p13 = por %p1705_p12, %p1704_p11 }
 0x8b3   : > { %p1707_p1 = pnand %p1706_p13, %p1700_p10 }
 0x8b5   : > { %1710 = shalt.err (!%p1707_p1)
}
 0x8b6   : > { %s1711_s22 = scalar_lea.hbm %s1299_s13, 64  ;;  %s1715_s19 = scalar_lea.hbm %s2217_s29, 128 }
 0x8b7   : > { %p1712_p2 = scmp.ne.s32.totalorder %s1299_s13, %s1711_s22  ;;  %p1716_p5 = scmp.lt.s32.totalorder %s1299_s13, %s2217_s29 }
 0x8b8   : > { %p1717_p6 = scmp.lt.s32.totalorder %s1715_s19, %s1711_s22 }
 0x8b9   : > { %p1713_p3 = pnand %p1712_p2, %p1947_p8 }
 0x8ba   : > { %p1718_p7 = por %p1717_p6, %p1716_p5 }
 0x8bb   : > { %p1714_p4 = pneg %p1713_p3 }
 0x8bd   : > { %p1719_p9 = pnand %p1718_p7, %p1714_p4 }
 0x8bf   : > { %1722 = shalt.err (!%p1719_p9)
}
 0x8c0   : > { %1587 = dma.vmem_to_hbm [thread:$0]  (%p1947_p8), %s1302_s2, 64, %s1299_s13, %s1288_s27  }
 0x8c1 PF: > { %s2219_s1 = sld [smem:[#allocation14_spill]] }
 0x8c2   : > { %s2220_s28 = sld [smem:[#allocation9_spill]] }
 0x8c7   : > { %p1593_p10 = scmp.ge.s32.totalorder %s2219_s1, 2 }
 0x8c8   : > { %s1313_s0 = sand.u32 1, %s2220_s28  }
 0x8c9   : > { %p1590_p11 = pnand %p1593_p10, %p1957_p0  ;;  %s1314_s16 = scalar_lea.sflag [#allocation6], %s1313_s0 }
 0x8cb   : > { %p1591_p12 = pneg %p1590_p11 }
 0x8cd   : > { %1758 = dma.done.wait (%p1591_p12), %s1314_s16, 64  }
 0x8ce   : > { %1760 = vsyncadd (%p1591_p12), %s1314_s16, 4294967232  ;;  %s37_s11 = sadd.s32 1, %s2219_s1   ;;  %s2222_s19 = sld [smem:[#allocation10_spill]] }
 0x8cf   : > { %p34_p13 = scmp.ge.s32.totalorder %s37_s11, 6   ;;  %s2223_s1 = sld [smem:[#allocation11_spill]] }
 0x8d0   : > { %s2224_s20 = sld [smem:[#allocation19_spill]] }
 0x8d1   : > { %s2225_s21 = sld [smem:[#allocation12_spill]]  ;;  %36 = sbr.rel (!%p34_p13) target bundleno = 37 (0x25), region = 152 }
 0x8d2   : > { %s2226_s22 = sld [smem:[#allocation13_spill]] }
 0x8d3   : > { %s2227_s2 = sld [smem:[#allocation15_spill]] }
 0x8d4   : > { %s2228_s23 = sld [smem:[#allocation17_spill]] }
 0x8d6   :  { %1319 = vsyncpa [#allocation6], 1 }
 0x8d7   :  { %1321 = vsyncpa [#allocation6 + $0x1], 1 }

</bundles_post_ra>
